<compile_context>
chip_gen: v5e
topology: v5e:2x2
jax: 0.10.0
libtpu: 0.0.40
codegen_flags: <defaults>
</compile_context>

<pallas_src>
import functools

import jax
import jax.numpy as jnp
from jax.experimental import pallas as pl
from jax.experimental.pallas import tpu as pltpu


def _round_up(x, m):
    return (x + m - 1) // m * m


@functools.lru_cache(maxsize=1)
def _single_tensorcore_chip():
    """True for single-TC chips (v5e / v6e); False (conservative) otherwise."""
    try:
        kind = jax.devices()[0].device_kind.lower()
    except Exception:
        return False
    return ("v5" in kind) or ("v6" in kind)


def _matmul_bias_relu_kernel(p_ref, w_ref, b_ref, o_ref, *, relu):
    """(tm, Kp) @ (Kp, tn) in a single MXU pass (full-K block), f32 accumulate
    via preferred_element_type; bias(+ReLU) epilogue fused; store o_ref dtype."""
    out = jnp.dot(p_ref[...], w_ref[...], preferred_element_type=jnp.float32)
    out = out + b_ref[...]                      # per-channel bias (BN folded)
    if relu:
        out = jnp.maximum(out, 0.0)
    o_ref[...] = out.astype(o_ref.dtype)


def fused_matmul_bias(p, w2, bias, *, relu, out_dtype):
    """p:(M,K) bf16, w2:(K,Cout) bf16 (BN scale pre-folded), bias:(Cout,) f32.

    Returns (M, Cout) in out_dtype.
    """
    M, K = p.shape
    Cout = w2.shape[1]
    single_tc = _single_tensorcore_chip()

    # Padded, lane/MXU-friendly shapes. K is taken whole (fits VMEM easily).
    Kp = _round_up(K, 128)
    Np = _round_up(Cout, 128)

    if M > 128:
        Mp = _round_up(M, 128)
        tm = 128
    else:
        Mp = _round_up(M, 16)          # native bf16 sublane tile is (16, 128)
        tm = Mp
        if Mp == 128 and not single_tc:
            tm = 64                    # 2 M tiles -> both v7x TensorCores busy

    if single_tc and Np % 256 == 0:
        tn = 256                       # v6e MXU width; single TC, fewer steps
    else:
        tn = 128                       # >=2 N tiles for Cout>=256 on v7x

    p_pad = jnp.pad(p, ((0, Mp - M), (0, Kp - K)))
    w_pad = jnp.pad(w2, ((0, Kp - K), (0, Np - Cout)))
    b_pad = jnp.pad(bias.reshape(1, Cout), ((0, 0), (0, Np - Cout)))

    grid = (Mp // tm, Np // tn)

    out_bytes = jnp.dtype(out_dtype).itemsize
    # Double-buffered full-K input blocks + bias + output tile, with headroom.
    vmem_need = 2 * (tm * Kp * 2 + Kp * tn * 2 + tn * 4 + tm * tn * out_bytes)
    vmem_limit = min(max(2 * vmem_need, 16 * 1024 * 1024), 32 * 1024 * 1024)

    cost = pl.CostEstimate(
        flops=2 * Mp * Kp * Np,
        transcendentals=0,
        bytes_accessed=Mp * Kp * 2 + Kp * Np * 2 + Np * 4 + Mp * Np * out_bytes,
    )

    out = pl.pallas_call(
        functools.partial(_matmul_bias_relu_kernel, relu=relu),
        out_shape=jax.ShapeDtypeStruct((Mp, Np), out_dtype),
        grid_spec=pltpu.PrefetchScalarGridSpec(
            num_scalar_prefetch=0,
            grid=grid,
            in_specs=[
                pl.BlockSpec((tm, Kp), lambda i, j: (i, 0)),   # patches
                pl.BlockSpec((Kp, tn), lambda i, j: (0, j)),   # folded weight
                pl.BlockSpec((1, tn), lambda i, j: (0, j)),    # bias
            ],
            out_specs=pl.BlockSpec((tm, tn), lambda i, j: (i, j)),
        ),
        compiler_params=pltpu.CompilerParams(
            dimension_semantics=("parallel", "parallel"),
            vmem_limit_bytes=vmem_limit,
        ),
        cost_estimate=cost,
    )(p_pad, w_pad, b_pad)

    return out[:M, :Cout]


@functools.partial(jax.jit, static_argnames=("stride", "relu", "out_dtype"))
def conv3x3_fused(x, w, scale, bias, *, stride, relu, out_dtype):
    """3x3 conv (padding=1, given stride) + fused eval-mode BN (+ReLU).

    x: (N, H, W, Cin) NHWC; w: (3,3,Cin,Cout) HWIO f32; scale/bias: (Cout,) f32.
    Returns (N, Ho, Wo, Cout) in out_dtype.
    """
    N, H, W, Cin = x.shape
    Cout = w.shape[-1]
    Ho = (H + 2 - 3) // stride + 1
    Wo = (W + 2 - 3) // stride + 1

    xp = jnp.pad(x.astype(jnp.bfloat16), ((0, 0), (1, 1), (1, 1), (0, 0)))
    # im2col (host-side layout plumbing): 9 shifted/strided bf16 views.
    taps = []
    for ky in range(3):
        for kx in range(3):
            taps.append(
                xp[:,
                   ky:ky + stride * (Ho - 1) + 1:stride,
                   kx:kx + stride * (Wo - 1) + 1:stride,
                   :])
    p = jnp.concatenate(taps, axis=-1).reshape(N * Ho * Wo, 9 * Cin)

    # Fold BN scale into the weight so the kernel epilogue is bias(+ReLU) only.
    w_folded = (w.astype(jnp.float32) * scale[None, None, None, :]
                ).reshape(9 * Cin, Cout)

    out = fused_matmul_bias(p, w_folded.astype(jnp.bfloat16),
                            bias.astype(jnp.float32),
                            relu=relu, out_dtype=out_dtype)
    return out.reshape(N, Ho, Wo, Cout)


def init_params(key, in_planes):
    """Deterministic synthetic parameters matching the PyTorch module shapes."""
    # (Cin, Cout, stride) for the eight conv+BN+ReLU blocks.
    block_defs = [
        (in_planes, 64, 2), (64, 64, 1),      # first_layer
        (64, 128, 2), (128, 128, 1),          # down_layer1
        (128, 256, 2), (256, 256, 1),         # down_layer2
        (256, 512, 2), (512, 512, 1),         # down_layer3
    ]
    blocks = []
    eps = 1e-5
    for cin, cout, stride in block_defs:
        key, kw, kg, kb = jax.random.split(key, 4)
        fan_in = 3 * 3 * cin
        w = jax.random.normal(kw, (3, 3, cin, cout), jnp.float32) * (2.0 / fan_in) ** 0.5
        gamma = 1.0 + 0.1 * jax.random.normal(kg, (cout,), jnp.float32)
        beta = 0.1 * jax.random.normal(kb, (cout,), jnp.float32)
        running_mean = jnp.zeros((cout,), jnp.float32)
        running_var = jnp.ones((cout,), jnp.float32)
        scale = gamma / jnp.sqrt(running_var + eps)
        bias = beta - running_mean * scale
        blocks.append((w, scale, bias, stride))

    # final_layer: Conv2d(512, 64, k=3, s=1, p=1) with bias, no BN/ReLU.
    key, kw, kb = jax.random.split(key, 3)
    fan_in = 3 * 3 * 512
    w_f = jax.random.normal(kw, (3, 3, 512, 64), jnp.float32) * (2.0 / fan_in) ** 0.5
    b_f = 0.1 * jax.random.normal(kb, (64,), jnp.float32)
    return {"blocks": blocks, "final": (w_f, b_f)}


def downsampling_forward(x_nchw, params):
    """Matches DownSampling.forward; input/output are NCHW like PyTorch."""
    x = jnp.transpose(x_nchw, (0, 2, 3, 1))                     # NCHW -> NHWC
    # Intermediate layers stay bf16 end-to-end (next layer consumes bf16).
    for w, scale, bias, stride in params["blocks"]:
        x = conv3x3_fused(x, w, scale, bias, stride=stride, relu=True,
                          out_dtype=jnp.bfloat16)
    w_f, b_f = params["final"]
    x = conv3x3_fused(x, w_f, jnp.ones_like(b_f), b_f, stride=1, relu=False,
                      out_dtype=jnp.float32)
    return jnp.transpose(x, (0, 3, 1, 2))                        # NHWC -> NCHW


if __name__ == "__main__":
    key = jax.random.PRNGKey(0)
    k_params, k_x = jax.random.split(key)

    in_planes = 4
    x = jax.random.normal(k_x, (2, in_planes, 16, 16), jnp.float32)  # NCHW

    params = init_params(k_params, in_planes)
    out = downsampling_forward(x, params)
    out = jax.block_until_ready(out)

    assert out.shape == (2, 64, 1, 1), out.shape
    assert out.dtype == jnp.float32, out.dtype
    print("KERNEL_OK")
</pallas_src>

<mosaic_0001>
module attributes {stable_mosaic.version = 11 : i64} {
  func.func @_matmul_bias_relu_kernel(%arg0: i32, %arg1: i32, %arg2: memref<64x128xbf16, #tpu.memory_space<vmem>>, %arg3: memref<128x128xbf16, #tpu.memory_space<vmem>>, %arg4: memref<1x128xf32, #tpu.memory_space<vmem>>, %arg5: memref<64x128xbf16, #tpu.memory_space<vmem>>) attributes {dimension_semantics = [#tpu.dimension_semantics<parallel>, #tpu.dimension_semantics<parallel>], iteration_bounds = array<i64: 2, 1>, scalar_prefetch = 0 : i64, scratch_operands = 0 : i64, tpu.core_type = #tpu.core_type<tc>, window_params = [{transform_indices = @transform_0, window_bounds = array<i64: 64, 128>}, {transform_indices = @transform_1, window_bounds = array<i64: 128, 128>}, {transform_indices = @transform_2, window_bounds = array<i64: 1, 128>}, {transform_indices = @transform_3, window_bounds = array<i64: 64, 128>}]} {
    %c0 = arith.constant 0 : index
    %c0_0 = arith.constant 0 : index
    %0 = vector.load %arg2[%c0, %c0_0] : memref<64x128xbf16, #tpu.memory_space<vmem>>, vector<64x128xbf16>
    %c0_1 = arith.constant 0 : index
    %c0_2 = arith.constant 0 : index
    %1 = vector.load %arg3[%c0_1, %c0_2] : memref<128x128xbf16, #tpu.memory_space<vmem>>, vector<128x128xbf16>
    %cst = arith.constant dense<0.000000e+00> : vector<64x128xf32>
    %2 = tpu.matmul %0, %1, %cst {dimension_numbers = #tpu.dot_dimension_numbers<[1], [0], [0], [1], [0, 0, 1, 1], [], []>} : vector<64x128xbf16>, vector<128x128xbf16>, vector<64x128xf32> -> vector<64x128xf32>
    %c0_3 = arith.constant 0 : index
    %c0_4 = arith.constant 0 : index
    %3 = vector.load %arg4[%c0_3, %c0_4] : memref<1x128xf32, #tpu.memory_space<vmem>>, vector<1x128xf32>
    %4 = vector.broadcast %3 : vector<1x128xf32> to vector<64x128xf32>
    %5 = arith.addf %2, %4 : vector<64x128xf32>
    %cst_5 = arith.constant 0.000000e+00 : f32
    %6 = vector.broadcast %cst_5 : f32 to vector<64x128xf32>
    %7 = arith.maximumf %5, %6 : vector<64x128xf32>
    %8 = arith.truncf %7 : vector<64x128xf32> to vector<64x128xbf16>
    %c0_6 = arith.constant 0 : index
    %c0_7 = arith.constant 0 : index
    %9 = vector.load %arg5[%c0_6, %c0_7] : memref<64x128xbf16, #tpu.memory_space<vmem>>, vector<64x128xbf16>
    tpu.vector_store %arg5[%c0_6, %c0_7], %8 {strides = array<i32>} : memref<64x128xbf16, #tpu.memory_space<vmem>>, vector<64x128xbf16>,
    return
  }
  func.func @transform_0(%arg0: i32, %arg1: i32) -> (i32, i32) {
    %c0_i32 = arith.constant 0 : i32
    %c0_i32_0 = arith.constant 0 : i32
    return %arg0, %c0_i32 : i32, i32
  }
  func.func @transform_1(%arg0: i32, %arg1: i32) -> (i32, i32) {
    %c0_i32 = arith.constant 0 : i32
    %c0_i32_0 = arith.constant 0 : i32
    return %c0_i32, %arg1 : i32, i32
  }
  func.func @transform_2(%arg0: i32, %arg1: i32) -> (i32, i32) {
    %c0_i32 = arith.constant 0 : i32
    %c0_i32_0 = arith.constant 0 : i32
    return %c0_i32, %arg1 : i32, i32
  }
  func.func @transform_3(%arg0: i32, %arg1: i32) -> (i32, i32) {
    %c0_i32 = arith.constant 0 : i32
    return %arg0, %arg1 : i32, i32
  }
}

</mosaic_0001>

<bundles_post_ra>
// kernel: conv3x3_fused.1
= control target key start
LH: loop header
LB: loop body
LE: loop exit
PB: predicated region body
PF: predicated region fallthrough
CT: control target
= control target key end

     0   :  { %8 = vsyncpa [#allocation3], 0  ;;  %s896_s0 = inlined_call_operand.vmem [shape: bf16[128,128], index: 0, kind: input, shape index: {}]   ;;  %s897_s1 = inlined_call_operand.vmem [shape: bf16[128,128], index: 1, kind: input, shape index: {}]   ;;  %s898_s2 = inlined_call_operand.vmem [shape: f32[1,128], index: 2, kind: input, shape index: {}]   ;;  %s899_s3 = inlined_call_operand.hbm [shape: bf16[128,128], index: 3, kind: output, shape index: {}]  }
   0x1   :  { %10 = vsyncpa [#allocation3 + $0x1], 0  ;;  %s769_s12 = smov 0   ;;  %s771_s13 = smov 0  }
   0x2   :  { %s773_s14 = smov 0   ;;  %s775_s15 = smov 0  }
   0x3   :  { %s777_s16 = smov 0   ;;  %s779_s17 = smov 0  }
   0x4 LB: > { %s486_s18 = sadd.s32 4294967295, %s745_s17   ;;  %s487_s19 = sadd.s32 4294967294, %s745_s17   ;;  %s745_s17 = sphi %s779_s17, %s16_s17   ;;  %s741_s16 = sphi %s777_s16, %s906_s16   ;;  %s737_s15 = sphi %s775_s15, %s905_s15   ;;  %s733_s14 = sphi %s773_s14, %s904_s14   ;;  %s729_s13 = sphi %s771_s13, %s903_s13   ;;  %s725_s12 = sphi %s769_s12, %s902_s12  }
   0x5   : > { %s28_s20 = sadd.s32 1, %s741_s16  ;;  %s115_s21 = sadd.s32 1, %s733_s14 }
   0x6   : > { %p30_p0 = scmp.ge.s32.totalorder %s28_s20, 2  ;;  %p125_p1 = scmp.ne.s32.totalorder %s733_s14, %s729_s13 }
   0x7   : > { %p126_p2 = scmp.eq.s32.totalorder %s486_s18, 1  ;;  %p131_p3 = scmp.ne.s32.totalorder %s729_s13, %s725_s12 }
   0x8   : > { %s908_s20 = smov (%p30_p0, %s28_s20), 0  ;;  %p132_p5 = scmp.eq.s32.totalorder %s487_s19, 1 }
   0x9   : > { %p809_p4 = por %p126_p2, %p125_p1  ;;  %s110_s23 = ssub.s32 %s741_s16, %s908_s20 }
   0xa   : > { %p492_p6 = scmp.ge.s32.totalorder %s745_s17, 1  ;;  %p113_p7 = scmp.eq.s32.totalorder %s110_s23, 0 }
   0xb   : > { %p816_p8 = por %p132_p5, %p131_p3  ;;  %p172_p9 = scmp.lt.s32.totalorder %s745_s17, 3 }
   0xc   : > { %s822_s25 = scalar_select %p113_p7, %s733_s14, %s115_s21  }
   0xd   : > { %p173_p10 = pnand %p492_p6, %p172_p9 }
   0xe   : > { %s494_s7 = sshll.u32 (!%p173_p10), %s737_s15, 3  ;;  %s200_s5 = sand.u32 (!%p173_p10), 1, %s729_s13  }
   0xf   : > { %176 = sbr.rel (%p173_p10) target bundleno = 204 (0xcc), region = 32  ;;  %p204_p11 = scmp.lt.s32.totalorder (!%p173_p10), %s494_s7, 15 }
  0x10   : > { %s493_s6 = sshll.u32 (!%p173_p10), %s200_s5, 5  ;;  %s687_s28 = scalar_lea.hbm (!%p173_p10), %s899_s3, 64 }
  0x11   : > { %s202_s11 = scalar_lea.vmem (!%p173_p10), [#allocation2], %s493_s6 }
  0x12   : > { %s384_s18 = sshll.u32 (!%p173_p10), %s202_s11, 4  ;;  %s385_s18 = int_to_ptr.vmem [resolvable:$true] %s384_s18 }
  0x14   : > { %v560_v0 = vld [vmem:[%s897_s1 + $0x38] sm:$0xff]  ;;  %v559_v1 = vld [vmem:[%s897_s1 + $0x30] sm:$0xff]  ;;  %v558_v2 = vld [vmem:[%s897_s1 + $0x28] sm:$0xff]  ;;  %s910_s7 = smov (!%p204_p11, %s494_s7), 15 }
  0x15   : > { %317 = vmatpush.bf16.msra.mxu0 %v560_v0  ;;  %585 = vmatpush.bf16.msra.mxu1 %v560_v0  ;;  %v557_v3 = vld [vmem:[%s897_s1 + $0x20] sm:$0xff]  ;;  %v556_v4 = vld [vmem:[%s897_s1 + $0x18] sm:$0xff]  ;;  %v555_v5 = vld [vmem:[%s897_s1 + $0x10] sm:$0xff]  ;;  %s495_s21 = sshll.u32 %s910_s7, 2  ;;  %s561_s7 = sshll.u32 %s737_s15, 5 }
  0x16   : > { %586 = vmatpush.bf16.msra.mxu2 %v560_v0  ;;  %587 = vmatpush.bf16.msra.mxu3 %v560_v0  ;;  %v554_v6 = vld [vmem:[%s897_s1 + $0x8] sm:$0xff]  ;;  %v553_v7 = vld [vmem:[%s897_s1] sm:$0xff]  ;;  %s207_s29 = scalar_lea.vmem %s896_s0, %s495_s21  ;;  %s383_s10 = scalar_lea.hbm %s899_s3, %s561_s7 }
  0x17   : > { %v549_v8 = vld [vmem:[%s207_s29] sm:$0xff]  ;;  %v550_v9 = vld [vmem:[%s207_s29 + $0x8] sm:$0xff]  ;;  %v551_v10 = vld [vmem:[%s207_s29 + $0x10] sm:$0xff]  ;;  %s386_s19 = sshll.u32 %s383_s10, 4  ;;  %s371_s15 = scalar_lea.sflag [#allocation3], %s200_s5  ;;  %s387_s19 = int_to_ptr.hbm [resolvable:$true] %s386_s19 }
  0x18   : > { %v552_v11 = vld [vmem:[%s207_s29 + $0x18] sm:$0xff]  ;;  %v666_v14 = vld [vmem:[%s898_s2] ss:$0 sm:$0xff]  ;;  %s681_s21 = sshra.s32 %s387_s19, 4  ;;  %s682_s21 = int_to_ptr.hbm [resolvable:$true] %s681_s21 }
  0x19   : > { %318 = vmatpush.bf16.msra.mxu0 %v559_v1  ;;  %588 = vmatpush.bf16.msra.mxu1 %v559_v1  ;;  %s683_s23 = scalar_lea.hbm %s682_s21, 32  ;;  %p688_p1 = scmp.lt.s32.totalorder %s682_s21, %s899_s3 }
  0x1a   : > { %589 = vmatpush.bf16.msra.mxu2 %v559_v1  ;;  %590 = vmatpush.bf16.msra.mxu3 %v559_v1  ;;  %p684_p12 = scmp.ne.s32.totalorder %s682_s21, %s683_s23  ;;  %p689_p2 = scmp.lt.s32.totalorder %s687_s28, %s683_s23 }
  0x1c   : > { %p685_p13 = pnand %p684_p12, %p809_p4  ;;  %p690_p3 = por %p689_p2, %p688_p1 }
  0x1d   : > { %319 = vmatpush.bf16.msra.mxu0 %v558_v2  ;;  %591 = vmatpush.bf16.msra.mxu1 %v558_v2 }
  0x1e   : > { %592 = vmatpush.bf16.msra.mxu2 %v558_v2  ;;  %593 = vmatpush.bf16.msra.mxu3 %v558_v2  ;;  %p686_p0 = pneg %p685_p13 }
  0x20   : > { %p691_p5 = pnand %p690_p3, %p686_p0 }
  0x21   : > { %320 = vmatpush.bf16.msra.mxu0 %v557_v3  ;;  %594 = vmatpush.bf16.msra.mxu1 %v557_v3 }
  0x22   : > { %595 = vmatpush.bf16.msra.mxu2 %v557_v3  ;;  %596 = vmatpush.bf16.msra.mxu3 %v557_v3 }
  0x25   : > { %321 = vmatpush.bf16.msra.mxu0 %v556_v4  ;;  %597 = vmatpush.bf16.msra.mxu1 %v556_v4 }
  0x26   : > { %598 = vmatpush.bf16.msra.mxu2 %v556_v4  ;;  %599 = vmatpush.bf16.msra.mxu3 %v556_v4 }
  0x29   : > { %322 = vmatpush.bf16.msra.mxu0 %v555_v5  ;;  %600 = vmatpush.bf16.msra.mxu1 %v555_v5 }
  0x2a   : > { %601 = vmatpush.bf16.msra.mxu2 %v555_v5  ;;  %602 = vmatpush.bf16.msra.mxu3 %v555_v5 }
  0x2d   : > { %323 = vmatpush.bf16.msra.mxu0 %v554_v6  ;;  %603 = vmatpush.bf16.msra.mxu1 %v554_v6 }
  0x2e   : > { %604 = vmatpush.bf16.msra.mxu2 %v554_v6  ;;  %605 = vmatpush.bf16.msra.mxu3 %v554_v6 }
  0x31   : > { %324 = vmatpush.bf16.msra.mxu0 %v553_v7  ;;  %606 = vmatpush.bf16.msra.mxu1 %v553_v7 }
  0x32   : > { %607 = vmatpush.bf16.msra.mxu2 %v553_v7  ;;  %608 = vmatpush.bf16.msra.mxu3 %v553_v7 }
  0x34   : > { %325 = vmatmul.bf16.vlgmr.msra.gmra.mxu0 %v549_v8  ;;  %330 = vmatmul.bf16.vlgmr.msra.gmra.mxu1 %v550_v9 }
  0x35   : > { %335 = vmatmul.bf16.vlgmr.msra.gmra.mxu2 %v551_v10  ;;  %340 = vmatmul.bf16.vlgmr.msra.gmra.mxu3 %v552_v11 }
  0xb1   : > { %v326_v12 = vpop.f32.mrf.mxu0  ;;  %v331_v13 = vpop.f32.mrf.mxu1 }
  0xb2   : > { %v327_v15 = vadd.f32 %v666_v14, %v326_v12  ;;  %v332_v16 = vadd.f32 %v666_v14, %v331_v13 }
  0xb4   : > { %v346_v23 = vmax.f32 %v327_v15, 0.0  ;;  %v348_v24 = vmax.f32 %v332_v16, 0.0 }
  0xb8   : > { %v336_v17 = vpop.f32.mrf.mxu2  ;;  %v341_v18 = vpop.f32.mrf.mxu3 }
  0xb9   : > { %v328_v19 = vpop.f32.mrf.mxu0  ;;  %v333_v20 = vpop.f32.mrf.mxu1  ;;  %v337_v29 = vadd.f32 %v666_v14, %v336_v17  ;;  %v342_v30 = vadd.f32 %v666_v14, %v341_v18 }
  0xba   : > { %v329_v21 = vadd.f32 %v666_v14, %v328_v19  ;;  %v334_v22 = vadd.f32 %v666_v14, %v333_v20 }
  0xbb   : > { %v350_v35 = vmax.f32 %v337_v29, 0.0  ;;  %v352_v36 = vmax.f32 %v342_v30, 0.0 }
  0xbc   : > { %v347_v25 = vmax.f32 %v329_v21, 0.0  ;;  %v349_v26 = vmax.f32 %v334_v22, 0.0 }
  0xbe   : > { %v565_v27 = vpack.c.bf16 %v347_v25, %v346_v23  ;;  %v570_v28 = vpack.c.bf16 %v349_v26, %v348_v24 }
  0xc0   : > { %566 = vst [vmem:[%s202_s11] sm:$0xff] %v565_v27   ;;  %v338_v31 = vpop.f32.mrf.mxu2  ;;  %v343_v32 = vpop.f32.mrf.mxu3 }
  0xc1   : > { %582 = vst [vmem:[%s202_s11 + $0x8] sm:$0xff] %v570_v28   ;;  %v339_v33 = vadd.f32 %v666_v14, %v338_v31  ;;  %v344_v34 = vadd.f32 %v666_v14, %v343_v32 }
  0xc3   : > { %v351_v37 = vmax.f32 %v339_v33, 0.0  ;;  %v353_v38 = vmax.f32 %v344_v34, 0.0 }
  0xc5   : > { %v575_v39 = vpack.c.bf16 %v351_v37, %v350_v35  ;;  %v580_v40 = vpack.c.bf16 %v353_v38, %v352_v36 }
  0xc7   : > { %583 = vst [vmem:[%s202_s11 + $0x10] sm:$0xff] %v575_v39  }
  0xc8   : > { %584 = vst [vmem:[%s202_s11 + $0x18] sm:$0xff] %v580_v40  }
  0xc9   : > { %694 = shalt.err (!%p691_p5)
}
  0xca   : > { %s747_s4 = smov 64   ;;  %s748_s5 = smov 4  }
  0xcb   : > { %609 = dma.vmem_to_hbm [thread:$0]  (%p809_p4), %s385_s18, 512, %s387_s19, %s371_s15, %s747_s4, %s747_s4, %s748_s5  }
  0xcc PF: > { %p615_p6 = scmp.ge.s32.totalorder %s745_s17, 2  ;;  %s401_s6 = sand.u32 1, %s725_s12  }
  0xcd   : > { %s402_s7 = scalar_lea.sflag [#allocation3], %s401_s6 }
  0xce   : > { %p612_p7 = pnand %p615_p6, %p816_p8 }
  0xd0   : > { %p613_p9 = pneg %p612_p7 }
  0xd2   : > { %720 = dma.done.wait (%p613_p9), %s402_s7, 512  }
  0xd3   : > { %722 = vsyncadd (%p613_p9), %s402_s7, 4294966784  ;;  %s16_s17 = sadd.s32 1, %s745_s17   ;;  %s902_s12 = smov %s729_s13 }
  0xd4   : > { %p13_p10 = scmp.ge.s32.totalorder %s16_s17, 4   ;;  %s903_s13 = smov %s733_s14 }
  0xd5   : > { %s904_s14 = smov %s822_s25  ;;  %s905_s15 = smov %s741_s16 }
  0xd6   : > { %s906_s16 = smov %s908_s20  ;;  %15 = sbr.rel (!%p13_p10) target bundleno = 4 (0x4), region = 73 }
  0xdb   :  { %408 = vsyncpa [#allocation3], 1 }
  0xdc   :  { %410 = vsyncpa [#allocation3 + $0x1], 1 }

</bundles_post_ra>
